<compile_context>
chip_gen: v6e
topology: v6e:2x2x1
jax: 0.10.0
libtpu: 0.0.40
codegen_flags: <defaults>
</compile_context>

<pallas_src>
import jax
import jax.numpy as jnp
from jax.experimental import pallas as pl
from jax.experimental.pallas import tpu as pltpu

LANE = 128  # lane width: pad channel dims to this so stores are lane-dense


def _head_kernel(x_ref, w1_ref, b1_ref, w2_ref, b2_ref, o_ref):
    # x_ref : (TM, 9*C)    im2col rows for this tile
    # w1_ref: (9*C, 128)   3x3 conv weight (BN scale folded), Cout padded to 128
    # b1_ref: (1, 128)     folded BN bias (+conv1 bias), padded
    # w2_ref: (128, 128)   1x1 conv weight, (Cin, Cout) zero-padded to 128x128
    # b2_ref: (1, 128)     1x1 conv bias, padded
    # o_ref : (TM, 128)    lane-dense output; first C2 columns are the real ones
    h = jnp.dot(x_ref[...], w1_ref[...], preferred_element_type=jnp.float32)
    h = jnp.maximum(h + b1_ref[...], 0.0)
    out = jnp.dot(h, w2_ref[...], preferred_element_type=jnp.float32)
    o_ref[...] = out + b2_ref[...]


@jax.jit
def classification_head(x_nchw, w1, b1, gamma, beta, run_mean, run_var, w2, b2,
                        eps=1e-5):
    """x_nchw: (N, C, H, W) float32. Returns (N, C2, H, W) float32."""
    N, C, H, W = x_nchw.shape
    C2 = w2.shape[0]
    K = 9 * C
    rows = N * H * W

    # --- im2col in the wrapper (XLA fuses pad/shift/concat) ---------------
    x = jnp.transpose(x_nchw, (0, 2, 3, 1)).astype(jnp.float32)        # NHWC
    x_pad = jnp.pad(x, ((0, 0), (1, 1), (1, 1), (0, 0)))
    taps = [x_pad[:, dy:dy + H, dx:dx + W, :]
            for dy in range(3) for dx in range(3)]
    x_col = jnp.concatenate(taps, axis=-1).reshape(rows, K)            # (rows, 9C)

    # --- fold eval-mode BN into conv1 weight/bias; pad channels to 128 ----
    scale = (gamma / jnp.sqrt(run_var + eps)).astype(jnp.float32)      # (C,)
    bias1 = (beta + scale * (b1 - run_mean)).astype(jnp.float32)       # (C,)
    # PyTorch conv weight (Cout, Cin, kh, kw) -> (kh*kw*Cin, Cout), tap-major
    w1_k = jnp.transpose(w1, (2, 3, 1, 0)).reshape(K, C).astype(jnp.float32)
    w1_k = w1_k * scale[None, :]                                       # fold BN scale
    w1_p = jnp.zeros((K, LANE), jnp.float32).at[:, :C].set(w1_k)
    b1_p = jnp.zeros((1, LANE), jnp.float32).at[:, :C].set(bias1)

    # 1x1 conv weight (C2, C, 1, 1) -> (C, C2), zero-padded to (128, 128)
    w2_k = jnp.transpose(w2.reshape(C2, C), (1, 0)).astype(jnp.float32)
    w2_p = jnp.zeros((LANE, LANE), jnp.float32).at[:C, :C2].set(w2_k)
    b2_p = jnp.zeros((1, LANE), jnp.float32).at[:, :C2].set(b2.astype(jnp.float32))

    # --- 2 parallel row-tiles (v7x: one per TC; v5e/v6e: cheap serial) ----
    n_tiles = 2 if (rows % 2 == 0 and (rows // 2) % 8 == 0) else 1
    tm = rows // n_tiles

    out_flat = pl.pallas_call(
        _head_kernel,
        out_shape=jax.ShapeDtypeStruct((rows, LANE), jnp.float32),
        grid_spec=pl.GridSpec(
            grid=(n_tiles,),
            in_specs=[
                pl.BlockSpec((tm, K), lambda i: (i, 0)),
                pl.BlockSpec((K, LANE), lambda i: (0, 0)),
                pl.BlockSpec((1, LANE), lambda i: (0, 0)),
                pl.BlockSpec((LANE, LANE), lambda i: (0, 0)),
                pl.BlockSpec((1, LANE), lambda i: (0, 0)),
            ],
            out_specs=pl.BlockSpec((tm, LANE), lambda i: (i, 0)),
        ),
        compiler_params=pltpu.CompilerParams(
            dimension_semantics=("parallel",)),
    )(x_col, w1_p, b1_p, w2_p, b2_p)

    # slice off the lane padding, back to NCHW like the PyTorch module
    out = out_flat[:, :C2].reshape(N, H, W, C2)
    return jnp.transpose(out, (0, 3, 1, 2))


def _reference(x_nchw, w1, b1, gamma, beta, run_mean, run_var, w2, b2, eps=1e-5):
    """Plain-JAX reference (NHWC convs) matching PyTorch eval-mode forward."""
    x = jnp.transpose(x_nchw, (0, 2, 3, 1))
    w1_hwio = jnp.transpose(w1, (2, 3, 1, 0))
    y = jax.lax.conv_general_dilated(
        x, w1_hwio, window_strides=(1, 1), padding="SAME",
        dimension_numbers=("NHWC", "HWIO", "NHWC")) + b1
    y = (y - run_mean) / jnp.sqrt(run_var + eps) * gamma + beta
    y = jnp.maximum(y, 0.0)
    w2_hwio = jnp.transpose(w2, (2, 3, 1, 0))
    z = jax.lax.conv_general_dilated(
        y, w2_hwio, window_strides=(1, 1), padding="VALID",
        dimension_numbers=("NHWC", "HWIO", "NHWC")) + b2
    return jnp.transpose(z, (0, 3, 1, 2))


if __name__ == "__main__":
    # Config: use_map=False, use_vis=False -> channel = 32
    #         category_num = 2, len(anchor_size) = 6 -> out channels = 12
    N, C, H, W = 2, 32, 16, 16
    category_num, anchor_num = 2, 6
    C2 = category_num * anchor_num

    key = jax.random.PRNGKey(0)
    ks = jax.random.split(key, 9)
    x = jax.random.normal(ks[0], (N, C, H, W), jnp.float32)
    w1 = jax.random.normal(ks[1], (C, C, 3, 3), jnp.float32) * 0.05
    b1 = jax.random.normal(ks[2], (C,), jnp.float32) * 0.05
    gamma = 1.0 + 0.1 * jax.random.normal(ks[3], (C,), jnp.float32)
    beta = 0.1 * jax.random.normal(ks[4], (C,), jnp.float32)
    run_mean = 0.1 * jax.random.normal(ks[5], (C,), jnp.float32)
    run_var = jnp.abs(jax.random.normal(ks[6], (C,), jnp.float32)) + 0.5
    w2 = jax.random.normal(ks[7], (C2, C, 1, 1), jnp.float32) * 0.05
    b2 = jax.random.normal(ks[8], (C2,), jnp.float32) * 0.05

    out = classification_head(x, w1, b1, gamma, beta, run_mean, run_var, w2, b2)
    out = jax.block_until_ready(out)

    ref = _reference(x, w1, b1, gamma, beta, run_mean, run_var, w2, b2)
    assert out.shape == (N, C2, H, W), out.shape
    assert jnp.allclose(out, ref, atol=1e-4, rtol=1e-4), (
        float(jnp.max(jnp.abs(out - ref))))

    print("KERNEL_OK")
</pallas_src>

<mosaic_0001>
module attributes {stable_mosaic.version = 11 : i64} {
  func.func @_head_kernel(%arg0: i32, %arg1: memref<256x288xf32, #tpu.memory_space<vmem>>, %arg2: memref<288x128xf32, #tpu.memory_space<vmem>>, %arg3: memref<1x128xf32, #tpu.memory_space<vmem>>, %arg4: memref<128x128xf32, #tpu.memory_space<vmem>>, %arg5: memref<1x128xf32, #tpu.memory_space<vmem>>, %arg6: memref<256x128xf32, #tpu.memory_space<vmem>>) attributes {dimension_semantics = [#tpu.dimension_semantics<parallel>], iteration_bounds = array<i64: 2>, scalar_prefetch = 0 : i64, scratch_operands = 0 : i64, tpu.core_type = #tpu.core_type<tc>, window_params = [{transform_indices = @transform_0, window_bounds = array<i64: 256, 288>}, {pipeline_mode = #tpu.pipeline_mode<synchronous>, transform_indices = @transform_1, window_bounds = array<i64: 288, 128>}, {pipeline_mode = #tpu.pipeline_mode<synchronous>, transform_indices = @transform_2, window_bounds = array<i64: 1, 128>}, {pipeline_mode = #tpu.pipeline_mode<synchronous>, transform_indices = @transform_3, window_bounds = array<i64: 128, 128>}, {pipeline_mode = #tpu.pipeline_mode<synchronous>, transform_indices = @transform_4, window_bounds = array<i64: 1, 128>}, {transform_indices = @transform_5, window_bounds = array<i64: 256, 128>}]} {
    %c0 = arith.constant 0 : index
    %c0_0 = arith.constant 0 : index
    %0 = vector.load %arg1[%c0, %c0_0] : memref<256x288xf32, #tpu.memory_space<vmem>>, vector<256x288xf32>
    %c0_1 = arith.constant 0 : index
    %c0_2 = arith.constant 0 : index
    %1 = vector.load %arg2[%c0_1, %c0_2] : memref<288x128xf32, #tpu.memory_space<vmem>>, vector<288x128xf32>
    %cst = arith.constant dense<0.000000e+00> : vector<256x128xf32>
    %2 = tpu.matmul %0, %1, %cst {dimension_numbers = #tpu.dot_dimension_numbers<[1], [0], [0], [1], [0, 0, 1, 1], [], []>} : vector<256x288xf32>, vector<288x128xf32>, vector<256x128xf32> -> vector<256x128xf32>
    %c0_3 = arith.constant 0 : index
    %c0_4 = arith.constant 0 : index
    %3 = vector.load %arg3[%c0_3, %c0_4] : memref<1x128xf32, #tpu.memory_space<vmem>>, vector<1x128xf32>
    %4 = vector.broadcast %3 : vector<1x128xf32> to vector<256x128xf32>
    %5 = arith.addf %2, %4 : vector<256x128xf32>
    %cst_5 = arith.constant 0.000000e+00 : f32
    %6 = vector.broadcast %cst_5 : f32 to vector<256x128xf32>
    %7 = arith.maximumf %5, %6 : vector<256x128xf32>
    %c0_6 = arith.constant 0 : index
    %c0_7 = arith.constant 0 : index
    %8 = vector.load %arg4[%c0_6, %c0_7] : memref<128x128xf32, #tpu.memory_space<vmem>>, vector<128x128xf32>
    %cst_8 = arith.constant dense<0.000000e+00> : vector<256x128xf32>
    %9 = tpu.matmul %7, %8, %cst_8 {dimension_numbers = #tpu.dot_dimension_numbers<[1], [0], [0], [1], [0, 0, 1, 1], [], []>} : vector<256x128xf32>, vector<128x128xf32>, vector<256x128xf32> -> vector<256x128xf32>
    %c0_9 = arith.constant 0 : index
    %c0_10 = arith.constant 0 : index
    %10 = vector.load %arg5[%c0_9, %c0_10] : memref<1x128xf32, #tpu.memory_space<vmem>>, vector<1x128xf32>
    %11 = vector.broadcast %10 : vector<1x128xf32> to vector<256x128xf32>
    %12 = arith.addf %9, %11 : vector<256x128xf32>
    %c0_11 = arith.constant 0 : index
    %c0_12 = arith.constant 0 : index
    %13 = vector.load %arg6[%c0_11, %c0_12] : memref<256x128xf32, #tpu.memory_space<vmem>>, vector<256x128xf32>
    tpu.vector_store %arg6[%c0_11, %c0_12], %12 {strides = array<i32>} : memref<256x128xf32, #tpu.memory_space<vmem>>, vector<256x128xf32>,
    return
  }
  func.func @transform_0(%arg0: i32) -> (i32, i32) {
    %c0_i32 = arith.constant 0 : i32
    %c0_i32_0 = arith.constant 0 : i32
    return %arg0, %c0_i32 : i32, i32
  }
  func.func @transform_1(%arg0: i32) -> (i32, i32) {
    %c0_i32 = arith.constant 0 : i32
    %c0_i32_0 = arith.constant 0 : i32
    %c0_i32_1 = arith.constant 0 : i32
    return %c0_i32, %c0_i32_0 : i32, i32
  }
  func.func @transform_2(%arg0: i32) -> (i32, i32) {
    %c0_i32 = arith.constant 0 : i32
    %c0_i32_0 = arith.constant 0 : i32
    %c0_i32_1 = arith.constant 0 : i32
    return %c0_i32, %c0_i32_0 : i32, i32
  }
  func.func @transform_3(%arg0: i32) -> (i32, i32) {
    %c0_i32 = arith.constant 0 : i32
    %c0_i32_0 = arith.constant 0 : i32
    %c0_i32_1 = arith.constant 0 : i32
    return %c0_i32, %c0_i32_0 : i32, i32
  }
  func.func @transform_4(%arg0: i32) -> (i32, i32) {
    %c0_i32 = arith.constant 0 : i32
    %c0_i32_0 = arith.constant 0 : i32
    %c0_i32_1 = arith.constant 0 : i32
    return %c0_i32, %c0_i32_0 : i32, i32
  }
  func.func @transform_5(%arg0: i32) -> (i32, i32) {
    %c0_i32 = arith.constant 0 : i32
    %c0_i32_0 = arith.constant 0 : i32
    return %arg0, %c0_i32 : i32, i32
  }
}

</mosaic_0001>

<bundles_post_ra>
// kernel: classification_head.1
= control target key start
LH: loop header
LB: loop body
LE: loop exit
PB: predicated region body
PF: predicated region fallthrough
CT: control target
= control target key end

     0   :  { %s1599_s18 = smov 0   ;;  %s2046_s0 = inlined_call_operand.vmem [shape: f32[512,288], index: 0, kind: input, shape index: {}]   ;;  %s2047_s1 = inlined_call_operand.vmem [shape: f32[288,128], index: 1, kind: input, shape index: {}]   ;;  %s2048_s2 = inlined_call_operand.vmem [shape: f32[1,128], index: 2, kind: input, shape index: {}]   ;;  %s2049_s3 = inlined_call_operand.vmem [shape: f32[128,128], index: 3, kind: input, shape index: {}]   ;;  %s2050_s4 = inlined_call_operand.vmem [shape: f32[1,128], index: 4, kind: input, shape index: {}]   ;;  %s2051_s5 = inlined_call_operand.vmem [shape: f32[512,128], index: 5, kind: output, shape index: {}]  }
   0x1 LB: > { %s1285_s19 = sadd.s32 4294967295, %s1566_s18   ;;  %p1289_p0 = scmp.ge.s32.totalorder %s1566_s18, 1  ;;  %s1566_s18 = sphi %s1599_s18, %s15_s18  }
   0x2   : > { %p189_p1 = scmp.lt.s32.totalorder %s1566_s18, 3 }
   0x4   : > { %p190_p2 = pnand %p1289_p0, %p189_p1 }
   0x5   : > { %s1290_s22 = sshll.u32 (!%p190_p2), %s1285_s19, 5 }
   0x6   : > { %193 = sbr.rel (%p190_p2) target bundleno = 597 (0x255), region = 40  ;;  %p219_p3 = scmp.lt.s32.totalorder (!%p190_p2), %s1290_s22, 63 }
   0xb   : > { %v342_v0 = vld [vmem:[%s2047_s1 + $0x78] sm:$0xff]  ;;  %v1568_v1 = vmov 0.0   ;;  %v341_v2 = vld [vmem:[%s2047_s1 + $0x70] sm:$0xff]  ;;  %v340_v3 = vld [vmem:[%s2047_s1 + $0x68] sm:$0xff]  ;;  %s2053_s22 = smov (!%p219_p3, %s1290_s22), 63  ;;  %vm370_vm0 = vcmask 261120  }
   0xc   : > { %467 = vmatprep.subr.mxu0 %v1568_v1  ;;  %v339_v4 = vld [vmem:[%s2047_s1 + $0x60] sm:$0xff]  ;;  %v338_v5 = vld [vmem:[%s2047_s1 + $0x58] sm:$0xff]  ;;  %s1550_s6 = smul.u32 24, %s2053_s22  ;;  %v337_v6 = vld [vmem:[%s2047_s1 + $0x50] sm:$0xff] }
   0xd   : > { %468 = vmatpush1.msra.mxu0 %v342_v0  ;;  %v362_v7 = vld [vmem:[%s2047_s1 + $0x118] sm:$0xff]  ;;  %v361_v8 = vld [vmem:[%s2047_s1 + $0x110] sm:$0xff]  ;;  %v336_v9 = vld [vmem:[%s2047_s1 + $0x48] sm:$0xff] }
   0xe   : > { %469 = vmatprep.subr.mxu0 %v1568_v1  ;;  %1414 = vmatprep.subr.mxu1 %v362_v7  ;;  %v360_v10 = vld [vmem:[%s2047_s1 + $0x108] sm:$0xff]  ;;  %s1649_s20 = scalar_lea.vmem %s2046_s0, %s1550_s6  ;;  %v335_v11 = vld [vmem:[%s2047_s1 + $0x40] sm:$0xff]  ;;  %v334_v14 = vld [vmem:[%s2047_s1 + $0x38] sm:$0xff] }
   0xf   : > { %470 = vmatpush1.msra.mxu0 %v341_v2  ;;  %1415 = vmatpush3.msra.mxu1 %v362_v7  ;;  %v359_v12 = vld [vmem:[%s2047_s1 + $0x100] sm:$0xff]  ;;  %v232_v13 = vld [vmem:[%s1649_s20 + $0x8] sm:$0xff]  ;;  %v233_v15 = vld [vmem:[%s1649_s20 + $0x10] sm:$0xff] }
  0x10   : > { %471 = vmatprep.subr.mxu0 %v1568_v1  ;;  %1416 = vmatprep.subr.mxu1 %v361_v8  ;;  %v333_v16 = vld [vmem:[%s2047_s1 + $0x30] sm:$0xff]  ;;  %v236_v17 = vld [vmem:[%s1649_s20 + $0x28] sm:$0xff]  ;;  %v239_v18 = vld [vmem:[%s1649_s20 + $0x40] sm:$0xff] }
  0x11   : > { %472 = vmatpush1.msra.mxu0 %v340_v3  ;;  %1417 = vmatpush3.msra.mxu1 %v361_v8  ;;  %v332_v19 = vld [vmem:[%s2047_s1 + $0x28] sm:$0xff]  ;;  %v331_v20 = vld [vmem:[%s2047_s1 + $0x20] sm:$0xff]  ;;  %v242_v21 = vld [vmem:[%s1649_s20 + $0x58] sm:$0xff] }
  0x12   : > { %473 = vmatprep.subr.mxu0 %v1568_v1  ;;  %1418 = vmatprep.subr.mxu1 %v360_v10  ;;  %v245_v22 = vld [vmem:[%s1649_s20 + $0x70] sm:$0xff]  ;;  %v330_v23 = vld [vmem:[%s2047_s1 + $0x18] sm:$0xff]  ;;  %v248_v25 = vld [vmem:[%s1649_s20 + $0x88] sm:$0xff] }
  0x13   : > { %474 = vmatpush1.msra.mxu0 %v339_v4  ;;  %1419 = vmatpush3.msra.mxu1 %v360_v10  ;;  %v329_v24 = vld [vmem:[%s2047_s1 + $0x10] sm:$0xff]  ;;  %v251_v26 = vld [vmem:[%s1649_s20 + $0xa0] sm:$0xff]  ;;  %v328_v27 = vld [vmem:[%s2047_s1 + $0x8] sm:$0xff] }
  0x14   : > { %475 = vmatprep.subr.mxu0 %v1568_v1  ;;  %1420 = vmatprep.subr.mxu1 %v359_v12  ;;  %v327_v28 = vld [vmem:[%s2047_s1] sm:$0xff]  ;;  %v254_v29 = vld [vmem:[%s1649_s20 + $0xb8] sm:$0xff]  ;;  %v257_v30 = vld [vmem:[%s1649_s20 + $0xd0] sm:$0xff] }
  0x15   : > { %476 = vmatpush1.msra.mxu0 %v338_v5  ;;  %531 = vmatprep.mubr.f32.mxu0 %v232_v13  ;;  %v358_v31 = vld [vmem:[%s2047_s1 + $0xf8] sm:$0xff]  ;;  %v357_v32 = vld [vmem:[%s2047_s1 + $0xf0] sm:$0xff]  ;;  %v260_v33 = vld [vmem:[%s1649_s20 + $0xe8] sm:$0xff] }
  0x16   : > { %477 = vmatprep.subr.mxu0 %v1568_v1  ;;  %1421 = vmatpush3.msra.mxu1 %v359_v12  ;;  %v263_v34 = vld [vmem:[%s1649_s20 + $0x100] sm:$0xff]  ;;  %v356_v35 = vld [vmem:[%s2047_s1 + $0xe8] sm:$0xff]  ;;  %v266_v37 = vld [vmem:[%s1649_s20 + $0x118] sm:$0xff] }
  0x17   : > { %478 = vmatpush1.msra.mxu0 %v337_v6  ;;  %1422 = vmatprep.mubr.msk.f32.mxu1 %vm370_vm0, %v233_v15  ;;  %v355_v36 = vld [vmem:[%s2047_s1 + $0xe0] sm:$0xff]  ;;  %v269_v38 = vld [vmem:[%s1649_s20 + $0x130] sm:$0xff]  ;;  %v354_v39 = vld [vmem:[%s2047_s1 + $0xd8] sm:$0xff] }
  0x18   : > { %479 = vmatprep.subr.mxu0 %v1568_v1  ;;  %1423 = vmatmul.mubr.msk.f32.vlgmr.msra.gmra.mxu1 %vm370_vm0, %v236_v17  ;;  %v353_v40 = vld [vmem:[%s2047_s1 + $0xd0] sm:$0xff]  ;;  %v272_v41 = vld [vmem:[%s1649_s20 + $0x148] sm:$0xff]  ;;  %v275_v42 = vld [vmem:[%s1649_s20 + $0x160] sm:$0xff] }
  0x19   : > { %480 = vmatpush1.msra.mxu0 %v336_v9  ;;  %1425 = vmatprep.mubr.msk.f32.mxu1 %vm370_vm0, %v239_v18  ;;  %v352_v43 = vld [vmem:[%s2047_s1 + $0xc8] sm:$0xff]  ;;  %v351_v44 = vld [vmem:[%s2047_s1 + $0xc0] sm:$0xff]  ;;  %v278_v45 = vld [vmem:[%s1649_s20 + $0x178] sm:$0xff] }
  0x1a   : > { %481 = vmatprep.subr.mxu0 %v1568_v1  ;;  %v281_v46 = vld [vmem:[%s1649_s20 + $0x190] sm:$0xff]  ;;  %v350_v47 = vld [vmem:[%s2047_s1 + $0xb8] sm:$0xff]  ;;  %v284_v49 = vld [vmem:[%s1649_s20 + $0x1a8] sm:$0xff] }
  0x1b   : > { %482 = vmatpush1.msra.mxu0 %v335_v11  ;;  %v349_v48 = vld [vmem:[%s2047_s1 + $0xb0] sm:$0xff]  ;;  %v287_v50 = vld [vmem:[%s1649_s20 + $0x1c0] sm:$0xff]  ;;  %v348_v51 = vld [vmem:[%s2047_s1 + $0xa8] sm:$0xff] }
  0x1c   : > { %483 = vmatprep.subr.mxu0 %v1568_v1  ;;  %1426 = vmatmul.mubr.msk.f32.gmra.mxu1 %vm370_vm0, %v242_v21  ;;  %v347_v52 = vld [vmem:[%s2047_s1 + $0xa0] sm:$0xff]  ;;  %v290_v53 = vld [vmem:[%s1649_s20 + $0x1d8] sm:$0xff]  ;;  %v293_v54 = vld [vmem:[%s1649_s20 + $0x1f0] sm:$0xff] }
  0x1d   : > { %484 = vmatpush1.msra.mxu0 %v334_v14  ;;  %1428 = vmatprep.mubr.msk.f32.mxu1 %vm370_vm0, %v245_v22  ;;  %v346_v55 = vld [vmem:[%s2047_s1 + $0x98] sm:$0xff]  ;;  %v345_v56 = vld [vmem:[%s2047_s1 + $0x90] sm:$0xff]  ;;  %v296_v57 = vld [vmem:[%s1649_s20 + $0x208] sm:$0xff] }
  0x1e   : > { %485 = vmatprep.subr.mxu0 %v1568_v1  ;;  %v299_v58 = vld [vmem:[%s1649_s20 + $0x220] sm:$0xff]  ;;  %v344_v59 = vld [vmem:[%s2047_s1 + $0x88] sm:$0xff]  ;;  %v302_v61 = vld [vmem:[%s1649_s20 + $0x238] sm:$0xff] }
  0x1f   : > { %486 = vmatpush1.msra.mxu0 %v333_v16  ;;  %v343_v60 = vld [vmem:[%s2047_s1 + $0x80] sm:$0xff]  ;;  %v964_v62 = vld [vmem:[%s2049_s3 + $0x78] sm:$0xff]  ;;  %v305_v0 = vld [vmem:[%s1649_s20 + $0x250] sm:$0xff] }
  0x20   : > { %487 = vmatprep.subr.mxu0 %v1568_v1  ;;  %1429 = vmatmul.mubr.msk.f32.gmra.mxu1 %vm370_vm0, %v248_v25  ;;  %v231_v63 = vld [vmem:[%s1649_s20] sm:$0xff]  ;;  %v963_v3 = vld [vmem:[%s2049_s3 + $0x70] sm:$0xff]  ;;  %v308_v4 = vld [vmem:[%s1649_s20 + $0x268] sm:$0xff] }
  0x21   : > { %488 = vmatpush1.msra.mxu0 %v332_v19  ;;  %1431 = vmatprep.mubr.msk.f32.mxu1 %vm370_vm0, %v251_v26  ;;  %v235_v2 = vld [vmem:[%s1649_s20 + $0x20] sm:$0xff]  ;;  %v234_v5 = vld [vmem:[%s1649_s20 + $0x18] sm:$0xff]  ;;  %v237_v10 = vld [vmem:[%s1649_s20 + $0x30] sm:$0xff] }
  0x22   : > { %489 = vmatprep.subr.mxu0 %v1568_v1  ;;  %1470 = vmatprep.subr.mxu1 %v964_v62  ;;  %v311_v6 = vld [vmem:[%s1649_s20 + $0x280] sm:$0xff]  ;;  %v238_v7 = vld [vmem:[%s1649_s20 + $0x38] sm:$0xff]  ;;  %v317_v11 = vld [vmem:[%s1649_s20 + $0x2b0] sm:$0xff] }
  0x23   : > { %490 = vmatpush1.msra.mxu0 %v331_v20  ;;  %1471 = vmatpush3.msra.mxu1 %v964_v62  ;;  %v961_v8 = vld [vmem:[%s2049_s3 + $0x60] sm:$0xff]  ;;  %v314_v9 = vld [vmem:[%s1649_s20 + $0x298] sm:$0xff]  ;;  %v241_v12 = vld [vmem:[%s1649_s20 + $0x50] sm:$0xff] }
  0x24   : > { %491 = vmatprep.subr.mxu0 %v1568_v1  ;;  %1432 = vmatmul.mubr.msk.f32.gmra.mxu1 %vm370_vm0, %v254_v29  ;;  %v960_v13 = vld [vmem:[%s2049_s3 + $0x58] sm:$0xff]  ;;  %v320_v14 = vld [vmem:[%s1649_s20 + $0x2c8] sm:$0xff]  ;;  %v323_v16 = vld [vmem:[%s1649_s20 + $0x2e0] sm:$0xff] }
  0x25   : > { %492 = vmatpush1.msra.mxu0 %v330_v23  ;;  %1434 = vmatprep.mubr.msk.f32.mxu1 %vm370_vm0, %v257_v30  ;;  %v240_v15 = vld [vmem:[%s1649_s20 + $0x48] sm:$0xff]  ;;  %v959_v18 = vld [vmem:[%s2049_s3 + $0x50] sm:$0xff]  ;;  %v326_v19 = vld [vmem:[%s1649_s20 + $0x2f8] sm:$0xff] }
  0x26   : > { %493 = vmatprep.subr.mxu0 %v1568_v1  ;;  %1472 = vmatprep.subr.mxu1 %v963_v3  ;;  %v244_v17 = vld [vmem:[%s1649_s20 + $0x68] sm:$0xff]  ;;  %v243_v20 = vld [vmem:[%s1649_s20 + $0x60] sm:$0xff]  ;;  %v250_v25 = vld [vmem:[%s1649_s20 + $0x98] sm:$0xff] }
  0x27   : > { %494 = vmatpush1.msra.mxu0 %v329_v24  ;;  %1473 = vmatpush3.msra.mxu1 %v963_v3  ;;  %v247_v21 = vld [vmem:[%s1649_s20 + $0x80] sm:$0xff]  ;;  %v958_v22 = vld [vmem:[%s2049_s3 + $0x48] sm:$0xff]  ;;  %v246_v24 = vld [vmem:[%s1649_s20 + $0x78] sm:$0xff] }
  0x28   : > { %495 = vmatprep.subr.mxu0 %v1568_v1  ;;  %1435 = vmatmul.mubr.msk.f32.gmra.mxu1 %vm370_vm0, %v260_v33  ;;  %v957_v23 = vld [vmem:[%s2049_s3 + $0x40] sm:$0xff]  ;;  %v956_v26 = vld [vmem:[%s2049_s3 + $0x38] sm:$0xff]  ;;  %v253_v29 = vld [vmem:[%s1649_s20 + $0xb0] sm:$0xff] }
  0x29   : > { %496 = vmatpush1.msra.mxu0 %v328_v27  ;;  %1437 = vmatprep.mubr.msk.f32.mxu1 %vm370_vm0, %v263_v34  ;;  %v955_v27 = vld [vmem:[%s2049_s3 + $0x30] sm:$0xff]  ;;  %v954_v30 = vld [vmem:[%s2049_s3 + $0x28] sm:$0xff]  ;;  %v255_v33 = vld [vmem:[%s1649_s20 + $0xc0] sm:$0xff] }
  0x2a   : > { %497 = vmatprep.subr.mxu0 %v1568_v1  ;;  %v259_v34 = vld [vmem:[%s1649_s20 + $0xe0] sm:$0xff]  ;;  %v297_v3 = vld [vmem:[%s1649_s20 + $0x210] sm:$0xff] }
  0x2b   : > { %498 = vmatpush1.msra.mxu0 %v327_v28  ;;  %v249_v28 = vld [vmem:[%s1649_s20 + $0x90] sm:$0xff]  ;;  %v291_v62 = vld [vmem:[%s1649_s20 + $0x1e0] sm:$0xff] }
  0x2c   : > { %499 = vmatprep.subr.mxu0 %v1568_v1  ;;  %1438 = vmatmul.mubr.msk.f32.gmra.mxu1 %vm370_vm0, %v266_v37  ;;  %v261_v37 = vld [vmem:[%s1649_s20 + $0xf0] sm:$0xff] }
  0x2d   : > { %500 = vmatpush2.msra.mxu0 %v358_v31  ;;  %1440 = vmatprep.mubr.msk.f32.mxu1 %vm370_vm0, %v269_v38  ;;  %v252_v31 = vld [vmem:[%s1649_s20 + $0xa8] sm:$0xff]  ;;  %v265_v38 = vld [vmem:[%s1649_s20 + $0x110] sm:$0xff] }
  0x2e   : > { %501 = vmatprep.subr.mxu0 %v1568_v1 }
  0x2f   : > { %502 = vmatpush2.msra.mxu0 %v357_v32  ;;  %v256_v32 = vld [vmem:[%s1649_s20 + $0xc8] sm:$0xff] }
  0x30   : > { %503 = vmatprep.subr.mxu0 %v1568_v1  ;;  %1441 = vmatmul.mubr.msk.f32.gmra.mxu1 %vm370_vm0, %v272_v41  ;;  %v267_v41 = vld [vmem:[%s1649_s20 + $0x120] sm:$0xff] }
  0x31   : > { %504 = vmatpush2.msra.mxu0 %v356_v35  ;;  %1443 = vmatprep.mubr.msk.f32.mxu1 %vm370_vm0, %v275_v42  ;;  %v258_v35 = vld [vmem:[%s1649_s20 + $0xd8] sm:$0xff]  ;;  %v271_v42 = vld [vmem:[%s1649_s20 + $0x140] sm:$0xff] }
  0x32   : > { %505 = vmatprep.subr.mxu0 %v1568_v1 }
  0x33   : > { %506 = vmatpush2.msra.mxu0 %v355_v36  ;;  %v262_v36 = vld [vmem:[%s1649_s20 + $0xf8] sm:$0xff] }
  0x34   : > { %507 = vmatprep.subr.mxu0 %v1568_v1  ;;  %1444 = vmatmul.mubr.msk.f32.gmra.mxu1 %vm370_vm0, %v278_v45  ;;  %v273_v45 = vld [vmem:[%s1649_s20 + $0x150] sm:$0xff] }
  0x35   : > { %508 = vmatpush2.msra.mxu0 %v354_v39  ;;  %1446 = vmatprep.mubr.msk.f32.mxu1 %vm370_vm0, %v281_v46  ;;  %v264_v39 = vld [vmem:[%s1649_s20 + $0x108] sm:$0xff]  ;;  %v277_v46 = vld [vmem:[%s1649_s20 + $0x170] sm:$0xff] }
  0x36   : > { %509 = vmatprep.subr.mxu0 %v1568_v1 }
  0x37   : > { %510 = vmatpush2.msra.mxu0 %v353_v40  ;;  %v268_v40 = vld [vmem:[%s1649_s20 + $0x128] sm:$0xff] }
  0x38   : > { %511 = vmatprep.subr.mxu0 %v1568_v1  ;;  %1447 = vmatmul.mubr.msk.f32.gmra.mxu1 %vm370_vm0, %v284_v49  ;;  %v279_v49 = vld [vmem:[%s1649_s20 + $0x180] sm:$0xff] }
  0x39   : > { %512 = vmatpush2.msra.mxu0 %v352_v43  ;;  %1449 = vmatprep.mubr.msk.f32.mxu1 %vm370_vm0, %v287_v50  ;;  %v270_v43 = vld [vmem:[%s1649_s20 + $0x138] sm:$0xff]  ;;  %v283_v50 = vld [vmem:[%s1649_s20 + $0x1a0] sm:$0xff] }
  0x3a   : > { %513 = vmatprep.subr.mxu0 %v1568_v1 }
  0x3b   : > { %514 = vmatpush2.msra.mxu0 %v351_v44  ;;  %v274_v44 = vld [vmem:[%s1649_s20 + $0x158] sm:$0xff] }
  0x3c   : > { %515 = vmatprep.subr.mxu0 %v1568_v1  ;;  %1450 = vmatmul.mubr.msk.f32.gmra.mxu1 %vm370_vm0, %v290_v53  ;;  %v286_v53 = vld [vmem:[%s1649_s20 + $0x1b8] sm:$0xff] }
  0x3d   : > { %516 = vmatpush2.msra.mxu0 %v350_v47  ;;  %1452 = vmatprep.mubr.msk.f32.mxu1 %vm370_vm0, %v293_v54  ;;  %v276_v47 = vld [vmem:[%s1649_s20 + $0x168] sm:$0xff]  ;;  %v952_v54 = vld [vmem:[%s2049_s3 + $0x18] sm:$0xff] }
  0x3e   : > { %517 = vmatprep.subr.mxu0 %v1568_v1 }
  0x3f   : > { %518 = vmatpush2.msra.mxu0 %v349_v48  ;;  %v280_v48 = vld [vmem:[%s1649_s20 + $0x188] sm:$0xff] }
  0x40   : > { %519 = vmatprep.subr.mxu0 %v1568_v1  ;;  %1453 = vmatmul.mubr.msk.f32.gmra.mxu1 %vm370_vm0, %v296_v57  ;;  %v289_v57 = vld [vmem:[%s1649_s20 + $0x1d0] sm:$0xff] }
  0x41   : > { %520 = vmatpush2.msra.mxu0 %v348_v51  ;;  %1455 = vmatprep.mubr.msk.f32.mxu1 %vm370_vm0, %v299_v58  ;;  %v953_v51 = vld [vmem:[%s2049_s3 + $0x20] sm:$0xff]  ;;  %v950_v58 = vld [vmem:[%s2049_s3 + $0x8] sm:$0xff] }
  0x42   : > { %521 = vmatprep.subr.mxu0 %v1568_v1 }
  0x43   : > { %522 = vmatpush2.msra.mxu0 %v347_v52  ;;  %v282_v52 = vld [vmem:[%s1649_s20 + $0x198] sm:$0xff] }
  0x44   : > { %523 = vmatprep.subr.mxu0 %v1568_v1  ;;  %1456 = vmatmul.mubr.msk.f32.gmra.mxu1 %vm370_vm0, %v302_v61  ;;  %v292_v61 = vld [vmem:[%s1649_s20 + $0x1e8] sm:$0xff] }
  0x45   : > { %524 = vmatpush2.msra.mxu0 %v346_v55  ;;  %1458 = vmatprep.mubr.msk.f32.mxu1 %vm370_vm0, %v305_v0  ;;  %v951_v55 = vld [vmem:[%s2049_s3 + $0x10] sm:$0xff]  ;;  %v294_v0 = vld [vmem:[%s1649_s20 + $0x1f8] sm:$0xff] }
  0x46   : > { %525 = vmatprep.subr.mxu0 %v1568_v1 }
  0x47   : > { %526 = vmatpush2.msra.mxu0 %v345_v56  ;;  %v285_v56 = vld [vmem:[%s1649_s20 + $0x1b0] sm:$0xff] }
  0x48   : > { %527 = vmatprep.subr.mxu0 %v1568_v1  ;;  %1459 = vmatmul.mubr.msk.f32.gmra.mxu1 %vm370_vm0, %v308_v4  ;;  %v301_v4 = vld [vmem:[%s1649_s20 + $0x230] sm:$0xff] }
  0x49   : > { %528 = vmatpush2.msra.mxu0 %v344_v59  ;;  %1461 = vmatprep.mubr.msk.f32.mxu1 %vm370_vm0, %v311_v6  ;;  %v949_v59 = vld [vmem:[%s2049_s3] sm:$0xff] }
  0x4a   : > { %529 = vmatprep.subr.mxu0 %v1568_v1  ;;  %v962_v1 = vld [vmem:[%s2049_s3 + $0x68] sm:$0xff]  ;;  %v303_v6 = vld [vmem:[%s1649_s20 + $0x240] sm:$0xff] }
  0x4b   : > { %530 = vmatpush2.msra.mxu0 %v343_v60  ;;  %1474 = vmatprep.subr.mxu1 %v962_v1  ;;  %v288_v60 = vld [vmem:[%s1649_s20 + $0x1c8] sm:$0xff] }
  0x4c   : > { %532 = vmatmul.mubr.f32.vlgmr.msra.gmra.mxu0 %v231_v63  ;;  %1475 = vmatpush3.msra.mxu1 %v962_v1  ;;  %v295_v63 = vld [vmem:[%s1649_s20 + $0x200] sm:$0xff]  ;;  %v300_v1 = vld [vmem:[%s1649_s20 + $0x228] sm:$0xff] }
  0x4d   : > { %536 = vmatprep.mubr.f32.mxu0 %v235_v2  ;;  %1476 = vmatprep.subr.mxu1 %v961_v8  ;;  %v298_v2 = vld [vmem:[%s1649_s20 + $0x218] sm:$0xff] }
  0x4e   : > { %1462 = vmatmul.mubr.msk.f32.gmra.mxu1 %vm370_vm0, %v314_v9  ;;  %v310_v9 = vld [vmem:[%s1649_s20 + $0x278] sm:$0xff] }
  0x4f   : > { %1464 = vmatprep.mubr.msk.f32.mxu1 %vm370_vm0, %v317_v11  ;;  %1477 = vmatpush3.msra.mxu1 %v961_v8  ;;  %v306_v8 = vld [vmem:[%s1649_s20 + $0x258] sm:$0xff]  ;;  %v313_v11 = vld [vmem:[%s1649_s20 + $0x290] sm:$0xff] }
  0x50   : > { %537 = vmatmul.mubr.f32.gmra.mxu0 %v234_v5  ;;  %1478 = vmatprep.subr.mxu1 %v960_v13  ;;  %v304_v5 = vld [vmem:[%s1649_s20 + $0x248] sm:$0xff] }
  0x51   : > { %541 = vmatprep.mubr.f32.mxu0 %v238_v7  ;;  %1479 = vmatpush3.msra.mxu1 %v960_v13  ;;  %v307_v7 = vld [vmem:[%s1649_s20 + $0x260] sm:$0xff]  ;;  %v316_v13 = vld [vmem:[%s1649_s20 + $0x2a8] sm:$0xff] }
  0x52   : > { %1465 = vmatmul.mubr.msk.f32.gmra.mxu1 %vm370_vm0, %v320_v14  ;;  %1480 = vmatprep.subr.mxu1 %v959_v18  ;;  %v315_v14 = vld [vmem:[%s1649_s20 + $0x2a0] sm:$0xff] }
  0x53   : > { %1467 = vmatprep.mubr.msk.f32.mxu1 %vm370_vm0, %v323_v16  ;;  %1481 = vmatpush3.msra.mxu1 %v959_v18  ;;  %v318_v16 = vld [vmem:[%s1649_s20 + $0x2b8] sm:$0xff]  ;;  %v321_v18 = vld [vmem:[%s1649_s20 + $0x2d0] sm:$0xff] }
  0x54   : > { %542 = vmatmul.mubr.f32.gmra.mxu0 %v237_v10  ;;  %1482 = vmatprep.subr.mxu1 %v958_v22  ;;  %v309_v10 = vld [vmem:[%s1649_s20 + $0x270] sm:$0xff] }
  0x55   : > { %546 = vmatprep.mubr.f32.mxu0 %v241_v12  ;;  %1483 = vmatpush3.msra.mxu1 %v958_v22  ;;  %v312_v12 = vld [vmem:[%s1649_s20 + $0x288] sm:$0xff]  ;;  %v1934_v22 = vld [vmem:[%s2048_s2] ss:$0 sm:$0xff] }
  0x56   : > { %1468 = vmatmul.mubr.msk.f32.gmra.mxu1 %vm370_vm0, %v326_v19  ;;  %1484 = vmatprep.subr.mxu1 %v957_v23  ;;  %v325_v19 = vld [vmem:[%s1649_s20 + $0x2f0] sm:$0xff] }
  0x57   : > { %1485 = vmatpush3.msra.mxu1 %v957_v23 }
  0x58   : > { %547 = vmatmul.mubr.f32.gmra.mxu0 %v240_v15  ;;  %1486 = vmatprep.subr.mxu1 %v956_v26  ;;  %v319_v15 = vld [vmem:[%s1649_s20 + $0x2c0] sm:$0xff] }
  0x59   : > { %551 = vmatprep.mubr.f32.mxu0 %v244_v17  ;;  %1487 = vmatpush3.msra.mxu1 %v956_v26  ;;  %v322_v17 = vld [vmem:[%s1649_s20 + $0x2d8] sm:$0xff] }
  0x5a   : > { %1488 = vmatprep.subr.mxu1 %v955_v27 }
  0x5b   : > { %1489 = vmatpush3.msra.mxu1 %v955_v27 }
  0x5c   : > { %552 = vmatmul.mubr.f32.gmra.mxu0 %v243_v20  ;;  %1490 = vmatprep.subr.mxu1 %v954_v30  ;;  %v324_v20 = vld [vmem:[%s1649_s20 + $0x2e8] sm:$0xff]  ;;  %s1293_s20 = sshll.u32 %s2053_s22, 3 }
  0x5d   : > { %556 = vmatprep.mubr.f32.mxu0 %v247_v21  ;;  %1491 = vmatpush3.msra.mxu1 %v954_v30  ;;  %s1977_s24 = scalar_lea.vmem %s2051_s5, %s1293_s20 }
  0x5e   : > { %1492 = vmatprep.subr.mxu1 %v953_v51 }
  0x5f   : > { %1493 = vmatpush3.msra.mxu1 %v953_v51 }
  0x60   : > { %557 = vmatmul.mubr.f32.gmra.mxu0 %v246_v24  ;;  %1494 = vmatprep.subr.mxu1 %v952_v54 }
  0x61   : > { %561 = vmatprep.mubr.f32.mxu0 %v250_v25  ;;  %1495 = vmatpush3.msra.mxu1 %v952_v54 }
  0x62   : > { %1496 = vmatprep.subr.mxu1 %v951_v55 }
  0x63   : > { %1497 = vmatpush3.msra.mxu1 %v951_v55 }
  0x64   : > { %562 = vmatmul.mubr.f32.gmra.mxu0 %v249_v28  ;;  %1498 = vmatprep.subr.mxu1 %v950_v58 }
  0x65   : > { %566 = vmatprep.mubr.f32.mxu0 %v253_v29  ;;  %1499 = vmatpush3.msra.mxu1 %v950_v58 }
  0x66   : > { %1500 = vmatprep.subr.mxu1 %v949_v59 }
  0x67   : > { %1501 = vmatpush3.msra.mxu1 %v949_v59 }
  0x68   : > { %567 = vmatmul.mubr.f32.gmra.mxu0 %v252_v31 }
  0x69   : > { %571 = vmatprep.mubr.f32.mxu0 %v256_v32 }
  0x6c   : > { %572 = vmatmul.mubr.f32.gmra.mxu0 %v255_v33 }
  0x6d   : > { %576 = vmatprep.mubr.f32.mxu0 %v259_v34 }
  0x70   : > { %577 = vmatmul.mubr.f32.gmra.mxu0 %v258_v35 }
  0x71   : > { %581 = vmatprep.mubr.f32.mxu0 %v262_v36 }
  0x74   : > { %582 = vmatmul.mubr.f32.gmra.mxu0 %v261_v37 }
  0x75   : > { %586 = vmatprep.mubr.f32.mxu0 %v265_v38 }
  0x78   : > { %587 = vmatmul.mubr.f32.gmra.mxu0 %v264_v39 }
  0x79   : > { %591 = vmatprep.mubr.f32.mxu0 %v268_v40 }
  0x7c   : > { %592 = vmatmul.mubr.f32.gmra.mxu0 %v267_v41 }
  0x7d   : > { %596 = vmatprep.mubr.f32.mxu0 %v271_v42 }
  0x80   : > { %597 = vmatmul.mubr.f32.gmra.mxu0 %v270_v43 }
  0x81   : > { %601 = vmatprep.mubr.f32.mxu0 %v274_v44 }
  0x84   : > { %602 = vmatmul.mubr.f32.gmra.mxu0 %v273_v45 }
  0x85   : > { %606 = vmatprep.mubr.f32.mxu0 %v277_v46 }
  0x88   : > { %607 = vmatmul.mubr.f32.gmra.mxu0 %v276_v47 }
  0x89   : > { %611 = vmatprep.mubr.f32.mxu0 %v280_v48 }
  0x8c   : > { %612 = vmatmul.mubr.f32.gmra.mxu0 %v279_v49 }
  0x8d   : > { %616 = vmatprep.mubr.f32.mxu0 %v283_v50 }
  0x90   : > { %617 = vmatmul.mubr.f32.gmra.mxu0 %v282_v52 }
  0x91   : > { %621 = vmatprep.mubr.f32.mxu0 %v286_v53 }
  0x94   : > { %622 = vmatmul.mubr.f32.gmra.mxu0 %v285_v56 }
  0x95   : > { %626 = vmatprep.mubr.f32.mxu0 %v289_v57 }
  0x98   : > { %627 = vmatmul.mubr.f32.gmra.mxu0 %v288_v60 }
  0x99   : > { %631 = vmatprep.mubr.f32.mxu0 %v292_v61 }
  0x9c   : > { %632 = vmatmul.mubr.f32.gmra.mxu0 %v291_v62 }
  0x9d   : > { %636 = vmatprep.mubr.f32.mxu0 %v295_v63 }
  0xa0   : > { %637 = vmatmul.mubr.f32.gmra.mxu0 %v294_v0 }
  0xa1   : > { %641 = vmatprep.mubr.f32.mxu0 %v298_v2 }
  0xa4   : > { %642 = vmatmul.mubr.f32.gmra.mxu0 %v297_v3 }
  0xa5   : > { %646 = vmatprep.mubr.f32.mxu0 %v301_v4 }
  0xa8   : > { %647 = vmatmul.mubr.f32.gmra.mxu0 %v300_v1 }
  0xa9   : > { %651 = vmatprep.mubr.f32.mxu0 %v304_v5 }
  0xac   : > { %652 = vmatmul.mubr.f32.gmra.mxu0 %v303_v6 }
  0xad   : > { %656 = vmatprep.mubr.f32.mxu0 %v307_v7 }
  0xb0   : > { %657 = vmatmul.mubr.f32.gmra.mxu0 %v306_v8 }
  0xb1   : > { %661 = vmatprep.mubr.f32.mxu0 %v310_v9 }
  0xb4   : > { %662 = vmatmul.mubr.f32.gmra.mxu0 %v309_v10 }
  0xb5   : > { %666 = vmatprep.mubr.f32.mxu0 %v313_v11 }
  0xb8   : > { %667 = vmatmul.mubr.f32.gmra.mxu0 %v312_v12 }
  0xb9   : > { %671 = vmatprep.mubr.f32.mxu0 %v316_v13 }
  0xbc   : > { %672 = vmatmul.mubr.f32.gmra.mxu0 %v315_v14 }
  0xbd   : > { %676 = vmatprep.mubr.f32.mxu0 %v319_v15 }
  0xc0   : > { %677 = vmatmul.mubr.f32.gmra.mxu0 %v318_v16 }
  0xc1   : > { %681 = vmatprep.mubr.f32.mxu0 %v322_v17 }
  0xc4   : > { %682 = vmatmul.mubr.f32.gmra.mxu0 %v321_v18 }
  0xc5   : > { %686 = vmatprep.mubr.f32.mxu0 %v325_v19 }
  0xc8   : > { %687 = vmatmul.mubr.f32.gmra.mxu0 %v324_v20 }
  0xd8   : > { %v1424_v21 = vpop.f32.mrf.mxu1 }
  0xda   : > { %v758_v24 = vpop.f32.mrf.mxu1 }
  0xdc   : > { %v1427_v29 = vpop.f32.mrf.mxu1 }
  0xde   : > { %v768_v35 = vpop.f32.mrf.mxu1 }
  0xe0   : > { %v1430_v41 = vpop.f32.mrf.mxu1 }
  0xe2   : > { %v778_v47 = vpop.f32.mrf.mxu1 }
  0xe4   : > { %v1433_v53 = vpop.f32.mrf.mxu1 }
  0xe6   : > { %v788_v59 = vpop.f32.mrf.mxu1 }
  0xe8   : > { %v1436_v2 = vpop.f32.mrf.mxu1 }
  0xea   : > { %v798_v7 = vpop.f32.mrf.mxu1 }
  0xec   : > { %v1439_v13 = vpop.f32.mrf.mxu1 }
  0xee   : > { %v808_v19 = vpop.f32.mrf.mxu1 }
 0x10c   : > { %v533_v23 = vpop.f32.mrf.mxu0 }
 0x10d   : > { %v534_v25 = vadd.f32 %v1934_v22, %v533_v23 }
 0x10e   : > { %v535_v26 = vpop.f32.mrf.mxu0 }
 0x10f   : > { %v759_v27 = vadd.f32 %v758_v24, %v534_v25  ;;  %v1442_v26 = vpop.f32.mrf.mxu1 }
 0x110   : > { %v538_v28 = vpop.f32.mrf.mxu0 }
 0x111   : > { %v917_v30 = vmax.f32 %v759_v27, 0.0  ;;  %v539_v31 = vadd.f32 %v1934_v22, %v538_v28 }
 0x112   : > { %v540_v32 = vpop.f32.mrf.mxu0 }
 0x113   : > { %v764_v33 = vadd.f32 %v1424_v21, %v539_v31  ;;  %1502 = vmatprep.mubr.f32.mxu1 %v917_v30  ;;  %v818_v32 = vpop.f32.mrf.mxu1 }
 0x114   : > { %v543_v34 = vpop.f32.mrf.mxu0 }
 0x115   : > { %v918_v36 = vmax.f32 %v764_v33, 0.0  ;;  %v544_v37 = vadd.f32 %v1934_v22, %v543_v34 }
 0x116   : > { %v545_v38 = vpop.f32.mrf.mxu0 }
 0x117   : > { %v769_v39 = vadd.f32 %v768_v35, %v544_v37  ;;  %1503 = vmatmul.mubr.f32.vlgmr.msra.gmra.mxu1 %v918_v36  ;;  %v1445_v38 = vpop.f32.mrf.mxu1 }
 0x118   : > { %v548_v40 = vpop.f32.mrf.mxu0 }
 0x119   : > { %v919_v42 = vmax.f32 %v769_v39, 0.0  ;;  %v549_v43 = vadd.f32 %v1934_v22, %v548_v40 }
 0x11a   : > { %v550_v44 = vpop.f32.mrf.mxu0 }
 0x11b   : > { %v774_v45 = vadd.f32 %v1427_v29, %v549_v43  ;;  %1505 = vmatprep.mubr.f32.mxu1 %v919_v42  ;;  %v828_v44 = vpop.f32.mrf.mxu1 }
 0x11c   : > { %v553_v46 = vpop.f32.mrf.mxu0 }
 0x11d   : > { %v920_v48 = vmax.f32 %v774_v45, 0.0  ;;  %v554_v49 = vadd.f32 %v1934_v22, %v553_v46 }
 0x11e   : > { %v555_v50 = vpop.f32.mrf.mxu0 }
 0x11f   : > { %v779_v51 = vadd.f32 %v778_v47, %v554_v49  ;;  %1506 = vmatmul.mubr.f32.gmra.mxu1 %v920_v48  ;;  %v1448_v50 = vpop.f32.mrf.mxu1 }
 0x120   : > { %v558_v52 = vpop.f32.mrf.mxu0 }
 0x121   : > { %v921_v54 = vmax.f32 %v779_v51, 0.0  ;;  %v559_v55 = vadd.f32 %v1934_v22, %v558_v52 }
 0x122   : > { %v560_v56 = vpop.f32.mrf.mxu0 }
 0x123   : > { %v784_v57 = vadd.f32 %v1430_v41, %v559_v55  ;;  %1508 = vmatprep.mubr.f32.mxu1 %v921_v54  ;;  %v838_v56 = vpop.f32.mrf.mxu1 }
 0x124   : > { %v563_v58 = vpop.f32.mrf.mxu0 }
 0x125   : > { %v922_v60 = vmax.f32 %v784_v57, 0.0  ;;  %v564_v61 = vadd.f32 %v1934_v22, %v563_v58 }
 0x126   : > { %v565_v62 = vpop.f32.mrf.mxu0 }
 0x127   : > { %v789_v63 = vadd.f32 %v788_v59, %v564_v61  ;;  %1509 = vmatmul.mubr.f32.gmra.mxu1 %v922_v60  ;;  %v1451_v62 = vpop.f32.mrf.mxu1 }
 0x128   : > { %v568_v0 = vpop.f32.mrf.mxu0 }
 0x129   : > { %v923_v3 = vmax.f32 %v789_v63, 0.0  ;;  %v569_v4 = vadd.f32 %v1934_v22, %v568_v0 }
 0x12a   : > { %v570_v1 = vpop.f32.mrf.mxu0 }
 0x12b   : > { %v794_v5 = vadd.f32 %v1433_v53, %v569_v4  ;;  %1511 = vmatprep.mubr.f32.mxu1 %v923_v3  ;;  %v848_v1 = vpop.f32.mrf.mxu1 }
 0x12c   : > { %v573_v6 = vpop.f32.mrf.mxu0 }
 0x12d   : > { %v924_v8 = vmax.f32 %v794_v5, 0.0  ;;  %v574_v9 = vadd.f32 %v1934_v22, %v573_v6 }
 0x12e   : > { %v575_v10 = vpop.f32.mrf.mxu0 }
 0x12f   : > { %v799_v11 = vadd.f32 %v798_v7, %v574_v9  ;;  %1512 = vmatmul.mubr.f32.gmra.mxu1 %v924_v8  ;;  %v1454_v10 = vpop.f32.mrf.mxu1 }
 0x130   : > { %v578_v12 = vpop.f32.mrf.mxu0 }
 0x131   : > { %v925_v14 = vmax.f32 %v799_v11, 0.0  ;;  %v579_v15 = vadd.f32 %v1934_v22, %v578_v12 }
 0x132   : > { %v580_v16 = vpop.f32.mrf.mxu0 }
 0x133   : > { %v804_v17 = vadd.f32 %v1436_v2, %v579_v15  ;;  %1514 = vmatprep.mubr.f32.mxu1 %v925_v14  ;;  %v858_v16 = vpop.f32.mrf.mxu1 }
 0x134   : > { %v583_v18 = vpop.f32.mrf.mxu0 }
 0x135   : > { %v926_v20 = vmax.f32 %v804_v17, 0.0  ;;  %v584_v21 = vadd.f32 %v1934_v22, %v583_v18 }
 0x136   : > { %v585_v23 = vpop.f32.mrf.mxu0 }
 0x137   : > { %v809_v24 = vadd.f32 %v808_v19, %v584_v21  ;;  %1515 = vmatmul.mubr.f32.gmra.mxu1 %v926_v20  ;;  %v1457_v23 = vpop.f32.mrf.mxu1 }
 0x138   : > { %v588_v25 = vpop.f32.mrf.mxu0 }
 0x139   : > { %v927_v27 = vmax.f32 %v809_v24, 0.0  ;;  %v589_v28 = vadd.f32 %v1934_v22, %v588_v25 }
 0x13a   : > { %v590_v29 = vpop.f32.mrf.mxu0 }
 0x13b   : > { %v814_v30 = vadd.f32 %v1439_v13, %v589_v28  ;;  %1517 = vmatprep.mubr.f32.mxu1 %v927_v27  ;;  %v868_v29 = vpop.f32.mrf.mxu1 }
 0x13c   : > { %v593_v31 = vpop.f32.mrf.mxu0 }
 0x13d   : > { %v928_v33 = vmax.f32 %v814_v30, 0.0  ;;  %v594_v34 = vadd.f32 %v1934_v22, %v593_v31 }
 0x13e   : > { %v595_v35 = vpop.f32.mrf.mxu0 }
 0x13f   : > { %v819_v36 = vadd.f32 %v818_v32, %v594_v34  ;;  %1518 = vmatmul.mubr.f32.gmra.mxu1 %v928_v33  ;;  %v1460_v35 = vpop.f32.mrf.mxu1 }
 0x140   : > { %v598_v37 = vpop.f32.mrf.mxu0 }
 0x141   : > { %v929_v39 = vmax.f32 %v819_v36, 0.0  ;;  %v599_v40 = vadd.f32 %v1934_v22, %v598_v37 }
 0x142   : > { %v600_v41 = vpop.f32.mrf.mxu0 }
 0x143   : > { %v824_v42 = vadd.f32 %v1442_v26, %v599_v40  ;;  %1520 = vmatprep.mubr.f32.mxu1 %v929_v39  ;;  %v878_v41 = vpop.f32.mrf.mxu1 }
 0x144   : > { %v603_v43 = vpop.f32.mrf.mxu0 }
 0x145   : > { %v930_v45 = vmax.f32 %v824_v42, 0.0  ;;  %v604_v46 = vadd.f32 %v1934_v22, %v603_v43 }
 0x146   : > { %v605_v47 = vpop.f32.mrf.mxu0 }
 0x147   : > { %v829_v48 = vadd.f32 %v828_v44, %v604_v46  ;;  %1521 = vmatmul.mubr.f32.gmra.mxu1 %v930_v45  ;;  %v1463_v47 = vpop.f32.mrf.mxu1 }
 0x148   : > { %v608_v49 = vpop.f32.mrf.mxu0 }
 0x149   : > { %v931_v51 = vmax.f32 %v829_v48, 0.0  ;;  %v609_v52 = vadd.f32 %v1934_v22, %v608_v49 }
 0x14a   : > { %v610_v53 = vpop.f32.mrf.mxu0 }
 0x14b   : > { %v834_v54 = vadd.f32 %v1445_v38, %v609_v52  ;;  %1523 = vmatprep.mubr.f32.mxu1 %v931_v51  ;;  %v888_v53 = vpop.f32.mrf.mxu1 }
 0x14c   : > { %v613_v55 = vpop.f32.mrf.mxu0 }
 0x14d   : > { %v932_v57 = vmax.f32 %v834_v54, 0.0  ;;  %v614_v58 = vadd.f32 %v1934_v22, %v613_v55 }
 0x14e   : > { %v615_v59 = vpop.f32.mrf.mxu0 }
 0x14f   : > { %v839_v60 = vadd.f32 %v838_v56, %v614_v58  ;;  %1524 = vmatmul.mubr.f32.gmra.mxu1 %v932_v57  ;;  %v1466_v59 = vpop.f32.mrf.mxu1 }
 0x150   : > { %v618_v61 = vpop.f32.mrf.mxu0 }
 0x151   : > { %v933_v63 = vmax.f32 %v839_v60, 0.0  ;;  %v619_v0 = vadd.f32 %v1934_v22, %v618_v61 }
 0x152   : > { %v620_v2 = vpop.f32.mrf.mxu0 }
 0x153   : > { %v844_v3 = vadd.f32 %v1448_v50, %v619_v0  ;;  %1526 = vmatprep.mubr.f32.mxu1 %v933_v63  ;;  %v898_v2 = vpop.f32.mrf.mxu1 }
 0x154   : > { %v623_v4 = vpop.f32.mrf.mxu0 }
 0x155   : > { %v934_v5 = vmax.f32 %v844_v3, 0.0  ;;  %v624_v6 = vadd.f32 %v1934_v22, %v623_v4 }
 0x156   : > { %v625_v7 = vpop.f32.mrf.mxu0 }
 0x157   : > { %v849_v8 = vadd.f32 %v848_v1, %v624_v6  ;;  %1527 = vmatmul.mubr.f32.gmra.mxu1 %v934_v5  ;;  %v1469_v7 = vpop.f32.mrf.mxu1 }
 0x158   : > { %v628_v9 = vpop.f32.mrf.mxu0 }
 0x159   : > { %v935_v11 = vmax.f32 %v849_v8, 0.0  ;;  %v629_v12 = vadd.f32 %v1934_v22, %v628_v9 }
 0x15a   : > { %v630_v13 = vpop.f32.mrf.mxu0 }
 0x15b   : > { %v854_v14 = vadd.f32 %v1451_v62, %v629_v12  ;;  %1529 = vmatprep.mubr.f32.mxu1 %v935_v11  ;;  %v908_v13 = vpop.f32.mrf.mxu1 }
 0x15c   : > { %v633_v15 = vpop.f32.mrf.mxu0 }
 0x15d   : > { %v936_v17 = vmax.f32 %v854_v14, 0.0  ;;  %v634_v18 = vadd.f32 %v1934_v22, %v633_v15 }
 0x15e   : > { %v635_v19 = vpop.f32.mrf.mxu0 }
 0x15f   : > { %v859_v20 = vadd.f32 %v858_v16, %v634_v18  ;;  %1530 = vmatmul.mubr.f32.gmra.mxu1 %v936_v17 }
 0x160   : > { %v638_v21 = vpop.f32.mrf.mxu0 }
 0x161   : > { %v937_v24 = vmax.f32 %v859_v20, 0.0  ;;  %v639_v25 = vadd.f32 %v1934_v22, %v638_v21 }
 0x162   : > { %v640_v26 = vpop.f32.mrf.mxu0 }
 0x163   : > { %v864_v27 = vadd.f32 %v1454_v10, %v639_v25  ;;  %1532 = vmatprep.mubr.f32.mxu1 %v937_v24  ;;  %v1972_v25 = vld [vmem:[%s2050_s4] ss:$0 sm:$0xff] }
 0x164   : > { %v643_v28 = vpop.f32.mrf.mxu0 }
 0x165   : > { %v938_v30 = vmax.f32 %v864_v27, 0.0  ;;  %v644_v31 = vadd.f32 %v1934_v22, %v643_v28 }
 0x166   : > { %v645_v32 = vpop.f32.mrf.mxu0 }
 0x167   : > { %v869_v33 = vadd.f32 %v868_v29, %v644_v31  ;;  %1533 = vmatmul.mubr.f32.gmra.mxu1 %v938_v30 }
 0x168   : > { %v648_v34 = vpop.f32.mrf.mxu0 }
 0x169   : > { %v939_v36 = vmax.f32 %v869_v33, 0.0  ;;  %v649_v37 = vadd.f32 %v1934_v22, %v648_v34 }
 0x16a   : > { %v650_v38 = vpop.f32.mrf.mxu0 }
 0x16b   : > { %v874_v39 = vadd.f32 %v1457_v23, %v649_v37  ;;  %1535 = vmatprep.mubr.f32.mxu1 %v939_v36 }
 0x16c   : > { %v653_v40 = vpop.f32.mrf.mxu0 }
 0x16d   : > { %v940_v42 = vmax.f32 %v874_v39, 0.0  ;;  %v654_v43 = vadd.f32 %v1934_v22, %v653_v40 }
 0x16e   : > { %v655_v44 = vpop.f32.mrf.mxu0 }
 0x16f   : > { %v879_v45 = vadd.f32 %v878_v41, %v654_v43  ;;  %1536 = vmatmul.mubr.f32.gmra.mxu1 %v940_v42 }
 0x170   : > { %v658_v46 = vpop.f32.mrf.mxu0 }
 0x171   : > { %v941_v48 = vmax.f32 %v879_v45, 0.0  ;;  %v659_v49 = vadd.f32 %v1934_v22, %v658_v46 }
 0x172   : > { %v660_v50 = vpop.f32.mrf.mxu0 }
 0x173   : > { %v884_v51 = vadd.f32 %v1460_v35, %v659_v49  ;;  %1538 = vmatprep.mubr.f32.mxu1 %v941_v48 }
 0x174   : > { %v663_v52 = vpop.f32.mrf.mxu0 }
 0x175   : > { %v942_v54 = vmax.f32 %v884_v51, 0.0  ;;  %v664_v55 = vadd.f32 %v1934_v22, %v663_v52 }
 0x176   : > { %v665_v56 = vpop.f32.mrf.mxu0 }
 0x177   : > { %v889_v57 = vadd.f32 %v888_v53, %v664_v55  ;;  %1539 = vmatmul.mubr.f32.gmra.mxu1 %v942_v54 }
 0x178   : > { %v668_v58 = vpop.f32.mrf.mxu0 }
 0x179   : > { %v943_v60 = vmax.f32 %v889_v57, 0.0  ;;  %v669_v61 = vadd.f32 %v1934_v22, %v668_v58 }
 0x17a   : > { %v670_v62 = vpop.f32.mrf.mxu0 }
 0x17b   : > { %v894_v63 = vadd.f32 %v1463_v47, %v669_v61  ;;  %1541 = vmatprep.mubr.f32.mxu1 %v943_v60 }
 0x17c   : > { %v673_v0 = vpop.f32.mrf.mxu0 }
 0x17d   : > { %v944_v3 = vmax.f32 %v894_v63, 0.0  ;;  %v674_v4 = vadd.f32 %v1934_v22, %v673_v0 }
 0x17e   : > { %v675_v1 = vpop.f32.mrf.mxu0 }
 0x17f   : > { %v899_v5 = vadd.f32 %v898_v2, %v674_v4  ;;  %1542 = vmatmul.mubr.f32.gmra.mxu1 %v944_v3 }
 0x180   : > { %v678_v6 = vpop.f32.mrf.mxu0 }
 0x181   : > { %v945_v8 = vmax.f32 %v899_v5, 0.0  ;;  %v679_v9 = vadd.f32 %v1934_v22, %v678_v6 }
 0x182   : > { %v680_v10 = vpop.f32.mrf.mxu0 }
 0x183   : > { %v904_v11 = vadd.f32 %v1466_v59, %v679_v9  ;;  %1544 = vmatprep.mubr.f32.mxu1 %v945_v8 }
 0x184   : > { %v683_v12 = vpop.f32.mrf.mxu0 }
 0x185   : > { %v946_v14 = vmax.f32 %v904_v11, 0.0  ;;  %v684_v15 = vadd.f32 %v1934_v22, %v683_v12 }
 0x186   : > { %v685_v16 = vpop.f32.mrf.mxu0 }
 0x187   : > { %v909_v17 = vadd.f32 %v908_v13, %v684_v15  ;;  %1545 = vmatmul.mubr.f32.gmra.mxu1 %v946_v14 }
 0x188   : > { %v688_v18 = vpop.f32.mrf.mxu0 }
 0x189   : > { %v947_v19 = vmax.f32 %v909_v17, 0.0  ;;  %v689_v20 = vadd.f32 %v1934_v22, %v688_v18 }
 0x18a   : > { %v690_v21 = vpop.f32.mrf.mxu0 }
 0x18b   : > { %v914_v23 = vadd.f32 %v1469_v7, %v689_v20  ;;  %1547 = vmatprep.mubr.f32.mxu1 %v947_v19 }
 0x18d   : > { %v948_v24 = vmax.f32 %v914_v23, 0.0 }
 0x18f   : > { %1548 = vmatmul.mubr.f32.gmra.mxu1 %v948_v24 }
 0x1d7   : > { %v1504_v22 = vpop.f32.mrf.mxu1 }
 0x1d8   : > { %v1044_v26 = vadd.f32 %v1504_v22, %v1972_v25 }
 0x1d9   : > { %v1038_v27 = vpop.f32.mrf.mxu1 }
 0x1da   : > { %1198 = vst [vmem:[%s1977_s24 + $0x8] sm:$0xff] %v1044_v26  ;;  %v1039_v28 = vadd.f32 %v1972_v25, %v1038_v27 }
 0x1dc   : > { %1197 = vst [vmem:[%s1977_s24] sm:$0xff] %v1039_v28 }
 0x1df   : > { %v1507_v29 = vpop.f32.mrf.mxu1 }
 0x1e0   : > { %v1054_v30 = vadd.f32 %v1507_v29, %v1972_v25 }
 0x1e1   : > { %v1048_v31 = vpop.f32.mrf.mxu1 }
 0x1e2   : > { %1200 = vst [vmem:[%s1977_s24 + $0x18] sm:$0xff] %v1054_v30  ;;  %v1049_v32 = vadd.f32 %v1972_v25, %v1048_v31 }
 0x1e4   : > { %1199 = vst [vmem:[%s1977_s24 + $0x10] sm:$0xff] %v1049_v32 }
 0x1e7   : > { %v1510_v33 = vpop.f32.mrf.mxu1 }
 0x1e8   : > { %v1064_v34 = vadd.f32 %v1510_v33, %v1972_v25 }
 0x1e9   : > { %v1058_v35 = vpop.f32.mrf.mxu1 }
 0x1ea   : > { %1202 = vst [vmem:[%s1977_s24 + $0x28] sm:$0xff] %v1064_v34  ;;  %v1059_v36 = vadd.f32 %v1972_v25, %v1058_v35 }
 0x1ec   : > { %1201 = vst [vmem:[%s1977_s24 + $0x20] sm:$0xff] %v1059_v36 }
 0x1ef   : > { %v1513_v37 = vpop.f32.mrf.mxu1 }
 0x1f0   : > { %v1074_v38 = vadd.f32 %v1513_v37, %v1972_v25 }
 0x1f1   : > { %v1068_v39 = vpop.f32.mrf.mxu1 }
 0x1f2   : > { %1204 = vst [vmem:[%s1977_s24 + $0x38] sm:$0xff] %v1074_v38  ;;  %v1069_v40 = vadd.f32 %v1972_v25, %v1068_v39 }
 0x1f4   : > { %1203 = vst [vmem:[%s1977_s24 + $0x30] sm:$0xff] %v1069_v40 }
 0x1f7   : > { %v1516_v41 = vpop.f32.mrf.mxu1 }
 0x1f8   : > { %v1084_v42 = vadd.f32 %v1516_v41, %v1972_v25 }
 0x1f9   : > { %v1078_v43 = vpop.f32.mrf.mxu1 }
 0x1fa   : > { %1206 = vst [vmem:[%s1977_s24 + $0x48] sm:$0xff] %v1084_v42  ;;  %v1079_v44 = vadd.f32 %v1972_v25, %v1078_v43 }
 0x1fc   : > { %1205 = vst [vmem:[%s1977_s24 + $0x40] sm:$0xff] %v1079_v44 }
 0x1ff   : > { %v1519_v45 = vpop.f32.mrf.mxu1 }
 0x200   : > { %v1094_v46 = vadd.f32 %v1519_v45, %v1972_v25 }
 0x201   : > { %v1088_v47 = vpop.f32.mrf.mxu1 }
 0x202   : > { %1208 = vst [vmem:[%s1977_s24 + $0x58] sm:$0xff] %v1094_v46  ;;  %v1089_v48 = vadd.f32 %v1972_v25, %v1088_v47 }
 0x204   : > { %1207 = vst [vmem:[%s1977_s24 + $0x50] sm:$0xff] %v1089_v48 }
 0x207   : > { %v1522_v49 = vpop.f32.mrf.mxu1 }
 0x208   : > { %v1104_v50 = vadd.f32 %v1522_v49, %v1972_v25 }
 0x209   : > { %v1098_v51 = vpop.f32.mrf.mxu1 }
 0x20a   : > { %1210 = vst [vmem:[%s1977_s24 + $0x68] sm:$0xff] %v1104_v50  ;;  %v1099_v52 = vadd.f32 %v1972_v25, %v1098_v51 }
 0x20c   : > { %1209 = vst [vmem:[%s1977_s24 + $0x60] sm:$0xff] %v1099_v52 }
 0x20f   : > { %v1525_v53 = vpop.f32.mrf.mxu1 }
 0x210   : > { %v1114_v54 = vadd.f32 %v1525_v53, %v1972_v25 }
 0x211   : > { %v1108_v55 = vpop.f32.mrf.mxu1 }
 0x212   : > { %1212 = vst [vmem:[%s1977_s24 + $0x78] sm:$0xff] %v1114_v54  ;;  %v1109_v56 = vadd.f32 %v1972_v25, %v1108_v55 }
 0x214   : > { %1211 = vst [vmem:[%s1977_s24 + $0x70] sm:$0xff] %v1109_v56 }
 0x217   : > { %v1528_v57 = vpop.f32.mrf.mxu1 }
 0x218   : > { %v1124_v58 = vadd.f32 %v1528_v57, %v1972_v25 }
 0x219   : > { %v1118_v59 = vpop.f32.mrf.mxu1 }
 0x21a   : > { %1214 = vst [vmem:[%s1977_s24 + $0x88] sm:$0xff] %v1124_v58  ;;  %v1119_v60 = vadd.f32 %v1972_v25, %v1118_v59 }
 0x21c   : > { %1213 = vst [vmem:[%s1977_s24 + $0x80] sm:$0xff] %v1119_v60 }
 0x21f   : > { %v1531_v61 = vpop.f32.mrf.mxu1 }
 0x220   : > { %v1134_v62 = vadd.f32 %v1531_v61, %v1972_v25 }
 0x221   : > { %v1128_v63 = vpop.f32.mrf.mxu1 }
 0x222   : > { %1216 = vst [vmem:[%s1977_s24 + $0x98] sm:$0xff] %v1134_v62  ;;  %v1129_v0 = vadd.f32 %v1972_v25, %v1128_v63 }
 0x224   : > { %1215 = vst [vmem:[%s1977_s24 + $0x90] sm:$0xff] %v1129_v0 }
 0x227   : > { %v1534_v2 = vpop.f32.mrf.mxu1 }
 0x228   : > { %v1144_v3 = vadd.f32 %v1534_v2, %v1972_v25 }
 0x229   : > { %v1138_v4 = vpop.f32.mrf.mxu1 }
 0x22a   : > { %1218 = vst [vmem:[%s1977_s24 + $0xa8] sm:$0xff] %v1144_v3  ;;  %v1139_v1 = vadd.f32 %v1972_v25, %v1138_v4 }
 0x22c   : > { %1217 = vst [vmem:[%s1977_s24 + $0xa0] sm:$0xff] %v1139_v1 }
 0x22f   : > { %v1537_v5 = vpop.f32.mrf.mxu1 }
 0x230   : > { %v1154_v6 = vadd.f32 %v1537_v5, %v1972_v25 }
 0x231   : > { %v1148_v7 = vpop.f32.mrf.mxu1 }
 0x232   : > { %1220 = vst [vmem:[%s1977_s24 + $0xb8] sm:$0xff] %v1154_v6  ;;  %v1149_v8 = vadd.f32 %v1972_v25, %v1148_v7 }
 0x234   : > { %1219 = vst [vmem:[%s1977_s24 + $0xb0] sm:$0xff] %v1149_v8 }
 0x237   : > { %v1540_v9 = vpop.f32.mrf.mxu1 }
 0x238   : > { %v1164_v10 = vadd.f32 %v1540_v9, %v1972_v25 }
 0x239   : > { %v1158_v11 = vpop.f32.mrf.mxu1 }
 0x23a   : > { %1222 = vst [vmem:[%s1977_s24 + $0xc8] sm:$0xff] %v1164_v10  ;;  %v1159_v12 = vadd.f32 %v1972_v25, %v1158_v11 }
 0x23c   : > { %1221 = vst [vmem:[%s1977_s24 + $0xc0] sm:$0xff] %v1159_v12 }
 0x23f   : > { %v1543_v13 = vpop.f32.mrf.mxu1 }
 0x240   : > { %v1174_v14 = vadd.f32 %v1543_v13, %v1972_v25 }
 0x241   : > { %v1168_v15 = vpop.f32.mrf.mxu1 }
 0x242   : > { %1224 = vst [vmem:[%s1977_s24 + $0xd8] sm:$0xff] %v1174_v14  ;;  %v1169_v16 = vadd.f32 %v1972_v25, %v1168_v15 }
 0x244   : > { %1223 = vst [vmem:[%s1977_s24 + $0xd0] sm:$0xff] %v1169_v16 }
 0x247   : > { %v1546_v17 = vpop.f32.mrf.mxu1 }
 0x248   : > { %v1184_v18 = vadd.f32 %v1546_v17, %v1972_v25 }
 0x249   : > { %v1178_v19 = vpop.f32.mrf.mxu1 }
 0x24a   : > { %1226 = vst [vmem:[%s1977_s24 + $0xe8] sm:$0xff] %v1184_v18  ;;  %v1179_v20 = vadd.f32 %v1972_v25, %v1178_v19 }
 0x24c   : > { %1225 = vst [vmem:[%s1977_s24 + $0xe0] sm:$0xff] %v1179_v20 }
 0x24f   : > { %v1549_v21 = vpop.f32.mrf.mxu1 }
 0x250   : > { %v1194_v23 = vadd.f32 %v1549_v21, %v1972_v25 }
 0x251   : > { %v1188_v24 = vpop.f32.mrf.mxu1 }
 0x252   : > { %1228 = vst [vmem:[%s1977_s24 + $0xf8] sm:$0xff] %v1194_v23  ;;  %v1189_v22 = vadd.f32 %v1972_v25, %v1188_v24 }
 0x254   : > { %1227 = vst [vmem:[%s1977_s24 + $0xf0] sm:$0xff] %v1189_v22 }
 0x255 PF: > { %s15_s18 = sadd.s32 1, %s1566_s18  }
 0x256   : > { %p12_p4 = scmp.ge.s32.totalorder %s15_s18, 4  }
 0x258   :  { %14 = sbr.rel (!%p12_p4) target bundleno = 1 (0x1), region = 70 }

</bundles_post_ra>
